<compile_context>
chip_gen: v7x
topology: tpu7x:2x2x1
jax: 0.10.0
libtpu: 0.0.40
codegen_flags: <defaults>
</compile_context>

<pallas_src>
import functools

import jax
import jax.numpy as jnp
from jax import lax
from jax.experimental import pallas as pl
from jax.experimental.pallas import tpu as pltpu


def _round_up(x, m):
    return (x + m - 1) // m * m


def _upconv_kernel(x_ref, w_ref, b_ref, o_ref, *, mout):
    # x_ref: (Mb, Kp)    nb row-stacked, zero-padded batch slabs (HP rows each)
    # w_ref: (3, Kp, No) block-Toeplitz, BN-folded conv weights
    # b_ref: (1, No)     BN-folded bias, tiled across w
    # o_ref: (Mb, No)    lane-dense output slab (rows >= mout are dead padding)
    #
    # 3x3 conv == sum over kh of one (mout, Kp) x (Kp, No) matmul; kw and ci
    # are folded into the contraction via the Toeplitz structure of w_ref.
    acc = jnp.dot(x_ref[pl.ds(0, mout), :], w_ref[0],
                  preferred_element_type=jnp.float32)
    for kh in (1, 2):
        acc = acc + jnp.dot(x_ref[pl.ds(kh, mout), :], w_ref[kh],
                            preferred_element_type=jnp.float32)

    y = jnp.maximum(acc + b_ref[...], 0.0)        # conv bias + BN shift + ReLU
    o_ref[pl.ds(0, mout), :] = y.astype(o_ref.dtype)
    tail = o_ref.shape[0] - mout                  # keep dead rows defined
    o_ref[pl.ds(mout, tail), :] = jnp.zeros((tail, o_ref.shape[1]), o_ref.dtype)


def build_upconv_params(wt, bias, gamma, beta, *, W, eps=1e-5,
                        operand_dtype=jnp.float32):
    """Fold eval-mode BatchNorm into the conv and build the block-Toeplitz
    weight / lane-tiled bias.  Weights are static: call once, reuse per step."""
    Cin, Cout = wt.shape[0], wt.shape[1]
    WP = W + 2
    Kp = _round_up(WP * Cin, 128)   # pad K to a lane multiple (unmasked vld)

    # ConvTranspose2d(stride=1, pad=1, k=3) == Conv2d(pad=1, k=3) with the
    # flipped / (in,out)-swapped kernel:
    #   W_conv[kh, kw, ci, co] = W_t[ci, co, 2-kh, 2-kw]
    w_conv = jnp.transpose(wt[:, :, ::-1, ::-1], (2, 3, 0, 1))   # (3,3,Cin,Cout)

    # Eval-mode BN with fresh running stats (mean=0, var=1), eps kept exact:
    #   y = s*(conv + bias) + beta,   s = gamma / sqrt(1 + eps)
    # TODO(synk): if the real model uses trained running stats, fold those here.
    scale = gamma / jnp.sqrt(1.0 + eps)
    w_conv = w_conv * scale[None, None, None, :]
    b_fold = bias * scale + beta

    # Block-Toeplitz weight over (kw, w):
    #   WB[kh, p*Cin+ci, w*Cout+co] = w_conv[kh, p-w, ci, co] if 0<=p-w<3 else 0
    p_idx = jnp.arange(WP)[:, None]                 # padded column p
    w_idx = jnp.arange(W)[None, :]                  # output column w
    kw_off = p_idx - w_idx
    band = (kw_off >= 0) & (kw_off < 3)
    kw_cl = jnp.clip(kw_off, 0, 2)
    blocks = w_conv[:, kw_cl]                       # (3, WP, W, Cin, Cout)
    blocks = blocks * band[None, :, :, None, None].astype(w_conv.dtype)
    wb = jnp.transpose(blocks, (0, 1, 3, 2, 4)).reshape(3, WP * Cin, W * Cout)
    wb = jnp.pad(wb, ((0, 0), (0, Kp - WP * Cin), (0, 0)))   # zero K rows

    # Bias tiled to lane layout: b_lane[w*Cout+co] = b_fold[co]; stays f32
    # (added to the f32 accumulator inside the kernel).
    b_lane = jnp.tile(b_fold, W).reshape(1, W * Cout).astype(jnp.float32)
    return wb.astype(operand_dtype), b_lane


@functools.partial(jax.jit, static_argnames=("operand_dtype",))
def up_conv_forward(x_nchw, wb, b_lane, *, operand_dtype=jnp.float32):
    """x_nchw: (N, Cin, H, W) f32.  wb/b_lane from build_upconv_params."""
    N, Cin, H, W = x_nchw.shape
    No = b_lane.shape[-1]
    Cout = No // W
    WP = W + 2
    Kp = wb.shape[1]

    # ---- static layout parameters -----------------------------------------
    sub = 8 if jnp.dtype(operand_dtype).itemsize >= 4 else 16   # sublane tile
    nb = 1                              # batch elements per grid step
    for cand in (4, 2):                 # cap at 4 so N>=8 still gives >=2
        if N % cand == 0:               # parallel steps (both v7x TCs busy)
            nb = cand
            break
    HP = _round_up(H, sub) + sub        # rows per batch slab (>= H+2, >= H+sub)
    Mb = nb * HP                        # rows per block
    Mout = Mb - sub                     # rows actually computed (mult. of sub)

    # NCHW -> zero-padded, row-stacked lane-major slab (N*HP, Kp).
    x_nhwc = jnp.transpose(x_nchw, (0, 2, 3, 1))                  # (N,H,W,Cin)
    x_pad = jnp.pad(x_nhwc, ((0, 0), (1, HP - H - 1), (1, 1), (0, 0)))
    x2d = x_pad.reshape(N, HP, WP * Cin)
    x2d = jnp.pad(x2d, ((0, 0), (0, 0), (0, Kp - WP * Cin)))      # K lane pad
    x_stack = x2d.reshape(N * HP, Kp).astype(operand_dtype)

    grid = (N // nb,)
    out_stack = pl.pallas_call(
        functools.partial(_upconv_kernel, mout=Mout),
        out_shape=jax.ShapeDtypeStruct((N * HP, No), jnp.float32),
        grid_spec=pltpu.PrefetchScalarGridSpec(
            num_scalar_prefetch=0,
            grid=grid,
            in_specs=[
                pl.BlockSpec((Mb, Kp), lambda g: (g, 0)),
                pl.BlockSpec((3, Kp, No), lambda g: (0, 0, 0)),   # resident
                pl.BlockSpec((1, No), lambda g: (0, 0)),
            ],
            out_specs=pl.BlockSpec((Mb, No), lambda g: (g, 0)),
        ),
        compiler_params=pltpu.CompilerParams(
            dimension_semantics=("parallel",)),
    )(x_stack, wb, b_lane)

    # (N*HP, W*Cout) -> NCHW (drop the per-slab padding rows).
    out = out_stack.reshape(N, HP, W, Cout)[:, :H]
    return jnp.transpose(out, (0, 3, 1, 2))


def _reference(x_nchw, wt, bias, gamma, beta, eps=1e-5):
    """Plain-JAX reference: equivalent forward conv + eval BN(eps) + ReLU."""
    Cout = wt.shape[1]
    x_nhwc = jnp.transpose(x_nchw, (0, 2, 3, 1))
    w_hwio = jnp.transpose(wt[:, :, ::-1, ::-1], (2, 3, 0, 1))
    y = lax.conv_general_dilated(
        x_nhwc, w_hwio, window_strides=(1, 1), padding="SAME",
        dimension_numbers=("NHWC", "HWIO", "NHWC"))
    y = y + bias.reshape(1, 1, 1, Cout)
    y = (gamma.reshape(1, 1, 1, Cout) * y / jnp.sqrt(1.0 + eps)
         + beta.reshape(1, 1, 1, Cout))
    y = jnp.maximum(y, 0.0)
    return jnp.transpose(y, (0, 3, 1, 2))


if __name__ == "__main__":
    N, Cin, Cout, H, W = 2, 8, 8, 16, 16

    key = jax.random.PRNGKey(0)
    kx, kw, kb, kg, kbe = jax.random.split(key, 5)

    x = jax.random.normal(kx, (N, Cin, H, W), dtype=jnp.float32)
    # ConvTranspose2d weight shape: (in_ch, out_ch, kH, kW)
    wt = jax.random.normal(kw, (Cin, Cout, 3, 3), dtype=jnp.float32) * 0.1
    bias = jax.random.normal(kb, (Cout,), dtype=jnp.float32) * 0.1
    gamma = 1.0 + 0.1 * jax.random.normal(kg, (Cout,), dtype=jnp.float32)
    beta = 0.1 * jax.random.normal(kbe, (Cout,), dtype=jnp.float32)

    ref = _reference(x, wt, bias, gamma, beta)

    # --- f32 operand path (exact check) ------------------------------------
    wb32, bl32 = build_upconv_params(wt, bias, gamma, beta, W=W)
    out32 = jax.block_until_ready(up_conv_forward(x, wb32, bl32))
    assert out32.shape == (N, Cout, H, W)
    assert jnp.allclose(out32, ref, atol=1e-4, rtol=1e-4), "f32 mismatch"

    # --- bf16 operand path, f32 MXU accumulation (v6e/v7x fast path) -------
    wb16, bl16 = build_upconv_params(wt, bias, gamma, beta, W=W,
                                     operand_dtype=jnp.bfloat16)
    out16 = jax.block_until_ready(
        up_conv_forward(x, wb16, bl16, operand_dtype=jnp.bfloat16))
    assert out16.shape == (N, Cout, H, W)
    assert jnp.allclose(out16, ref, atol=5e-2, rtol=5e-2), "bf16 mismatch"

    print("KERNEL_OK")
</pallas_src>

<mosaic_0001>
module attributes {stable_mosaic.version = 11 : i64} {
  func.func @_upconv_kernel(%arg0: i32, %arg1: memref<48x256xf32, #tpu.memory_space<vmem>>, %arg2: memref<3x256x128xf32, #tpu.memory_space<vmem>>, %arg3: memref<1x128xf32, #tpu.memory_space<vmem>>, %arg4: memref<48x128xf32, #tpu.memory_space<vmem>>) attributes {dimension_semantics = [#tpu.dimension_semantics<parallel>], iteration_bounds = array<i64: 1>, scalar_prefetch = 0 : i64, scratch_operands = 0 : i64, tpu.core_type = #tpu.core_type<tc>, window_params = [{transform_indices = @transform_0, window_bounds = array<i64: 48, 256>}, {pipeline_mode = #tpu.pipeline_mode<synchronous>, transform_indices = @transform_1, window_bounds = array<i64: 3, 256, 128>}, {pipeline_mode = #tpu.pipeline_mode<synchronous>, transform_indices = @transform_2, window_bounds = array<i64: 1, 128>}, {transform_indices = @transform_3, window_bounds = array<i64: 48, 128>}]} {
    %c0 = arith.constant 0 : index
    %c0_0 = arith.constant 0 : index
    %0 = vector.load %arg1[%c0, %c0_0] : memref<48x256xf32, #tpu.memory_space<vmem>>, vector<40x256xf32>
    %c0_1 = arith.constant 0 : index
    %c0_2 = arith.constant 0 : index
    %c0_3 = arith.constant 0 : index
    %1 = vector.load %arg2[%c0_1, %c0_2, %c0_3] : memref<3x256x128xf32, #tpu.memory_space<vmem>>, vector<1x256x128xf32>
    %2 = vector.shape_cast %1 : vector<1x256x128xf32> to vector<256x128xf32>
    %cst = arith.constant dense<0.000000e+00> : vector<40x128xf32>
    %3 = tpu.matmul %0, %2, %cst {dimension_numbers = #tpu.dot_dimension_numbers<[1], [0], [0], [1], [0, 0, 1, 1], [], []>} : vector<40x256xf32>, vector<256x128xf32>, vector<40x128xf32> -> vector<40x128xf32>
    %c1 = arith.constant 1 : index
    %c0_4 = arith.constant 0 : index
    %4 = vector.load %arg1[%c1, %c0_4] : memref<48x256xf32, #tpu.memory_space<vmem>>, vector<40x256xf32>
    %c1_5 = arith.constant 1 : index
    %c0_6 = arith.constant 0 : index
    %c0_7 = arith.constant 0 : index
    %5 = vector.load %arg2[%c1_5, %c0_6, %c0_7] : memref<3x256x128xf32, #tpu.memory_space<vmem>>, vector<1x256x128xf32>
    %6 = vector.shape_cast %5 : vector<1x256x128xf32> to vector<256x128xf32>
    %cst_8 = arith.constant dense<0.000000e+00> : vector<40x128xf32>
    %7 = tpu.matmul %4, %6, %cst_8 {dimension_numbers = #tpu.dot_dimension_numbers<[1], [0], [0], [1], [0, 0, 1, 1], [], []>} : vector<40x256xf32>, vector<256x128xf32>, vector<40x128xf32> -> vector<40x128xf32>
    %8 = arith.addf %3, %7 : vector<40x128xf32>
    %c2 = arith.constant 2 : index
    %c0_9 = arith.constant 0 : index
    %9 = vector.load %arg1[%c2, %c0_9] : memref<48x256xf32, #tpu.memory_space<vmem>>, vector<40x256xf32>
    %c2_10 = arith.constant 2 : index
    %c0_11 = arith.constant 0 : index
    %c0_12 = arith.constant 0 : index
    %10 = vector.load %arg2[%c2_10, %c0_11, %c0_12] : memref<3x256x128xf32, #tpu.memory_space<vmem>>, vector<1x256x128xf32>
    %11 = vector.shape_cast %10 : vector<1x256x128xf32> to vector<256x128xf32>
    %cst_13 = arith.constant dense<0.000000e+00> : vector<40x128xf32>
    %12 = tpu.matmul %9, %11, %cst_13 {dimension_numbers = #tpu.dot_dimension_numbers<[1], [0], [0], [1], [0, 0, 1, 1], [], []>} : vector<40x256xf32>, vector<256x128xf32>, vector<40x128xf32> -> vector<40x128xf32>
    %13 = arith.addf %8, %12 : vector<40x128xf32>
    %c0_14 = arith.constant 0 : index
    %c0_15 = arith.constant 0 : index
    %14 = vector.load %arg3[%c0_14, %c0_15] : memref<1x128xf32, #tpu.memory_space<vmem>>, vector<1x128xf32>
    %15 = vector.broadcast %14 : vector<1x128xf32> to vector<40x128xf32>
    %16 = arith.addf %13, %15 : vector<40x128xf32>
    %cst_16 = arith.constant 0.000000e+00 : f32
    %17 = vector.broadcast %cst_16 : f32 to vector<40x128xf32>
    %18 = arith.maximumf %16, %17 : vector<40x128xf32>
    %c0_17 = arith.constant 0 : index
    %c0_18 = arith.constant 0 : index
    %19 = vector.load %arg4[%c0_17, %c0_18] : memref<48x128xf32, #tpu.memory_space<vmem>>, vector<40x128xf32>
    tpu.vector_store %arg4[%c0_17, %c0_18], %18 {strides = array<i32>} : memref<48x128xf32, #tpu.memory_space<vmem>>, vector<40x128xf32>,
    %cst_19 = arith.constant 0.000000e+00 : f32
    %20 = vector.broadcast %cst_19 : f32 to vector<8x128xf32>
    %c40 = arith.constant 40 : index
    %c0_20 = arith.constant 0 : index
    %21 = vector.load %arg4[%c40, %c0_20] : memref<48x128xf32, #tpu.memory_space<vmem>>, vector<8x128xf32>
    tpu.vector_store %arg4[%c40, %c0_20], %20 {strides = array<i32>} : memref<48x128xf32, #tpu.memory_space<vmem>>, vector<8x128xf32>,
    return
  }
  func.func @transform_0(%arg0: i32) -> (i32, i32) {
    %c0_i32 = arith.constant 0 : i32
    %c0_i32_0 = arith.constant 0 : i32
    return %arg0, %c0_i32 : i32, i32
  }
  func.func @transform_1(%arg0: i32) -> (i32, i32, i32) {
    %c0_i32 = arith.constant 0 : i32
    %c0_i32_0 = arith.constant 0 : i32
    %c0_i32_1 = arith.constant 0 : i32
    %c0_i32_2 = arith.constant 0 : i32
    return %c0_i32, %c0_i32_0, %c0_i32_1 : i32, i32, i32
  }
  func.func @transform_2(%arg0: i32) -> (i32, i32) {
    %c0_i32 = arith.constant 0 : i32
    %c0_i32_0 = arith.constant 0 : i32
    %c0_i32_1 = arith.constant 0 : i32
    return %c0_i32, %c0_i32_0 : i32, i32
  }
  func.func @transform_3(%arg0: i32) -> (i32, i32) {
    %c0_i32 = arith.constant 0 : i32
    %c0_i32_0 = arith.constant 0 : i32
    return %arg0, %c0_i32 : i32, i32
  }
}

</mosaic_0001>

<bundles_post_ra>
// kernel: up_conv_forward.1
= control target key start
LH: loop header
LB: loop body
LE: loop exit
PB: predicated region body
PF: predicated region fallthrough
CT: control target
= control target key end

     0   :  { %vm113_vm0 = vcmask 1046528   ;;  %vm367_vm1 = vcmask 1045504   ;;  %s1289_s1 = inlined_call_operand.vmem [shape: f32[3,256,128], index: 1, kind: input, shape index: {}]   ;;  %s1290_s0 = inlined_call_operand.vmem [shape: f32[48,256], index: 0, kind: input, shape index: {}]   ;;  %s1291_s3 = inlined_call_operand.vmem [shape: f32[48,128], index: 3, kind: output, shape index: {}]   ;;  %s1292_s2 = inlined_call_operand.vmem [shape: f32[1,128], index: 2, kind: input, shape index: {}]  }
   0x1   :  { %v538_v0 = vld [vmem:[%s1289_s1 + $0x180] sm:$0xff]  ;;  %v539_v1 = vld [vmem:[%s1289_s1 + $0x188] sm:$0xff]  ;;  %v540_v11 = vld [vmem:[%s1289_s1 + $0x190] sm:$0xff] }
   0x2   :  { %v40_v2 = vld [vmem:[%s1289_s1 + $0x80] sm:$0xff]  ;;  %v728_v3 = vpack.c.bf16 %v539_v1, %v538_v0  ;;  %v41_v4 = vld [vmem:[%s1289_s1 + $0x88] sm:$0xff]  ;;  %v541_v13 = vld [vmem:[%s1289_s1 + $0x198] sm:$0xff] }
   0x3   :  { %v522_v5 = vld [vmem:[%s1289_s1 + $0x100] sm:$0xff]  ;;  %v523_v6 = vld [vmem:[%s1289_s1 + $0x108] sm:$0xff]  ;;  %v760_v7 = vpack.c.bf16 %v41_v4, %v40_v2  ;;  %v42_v14 = vld [vmem:[%s1289_s1 + $0x90] sm:$0xff]  ;;  %v732_v16 = vpack.c.bf16 %v541_v13, %v540_v11 }
   0x4   :  { %v730_v8 = vpack.c.bf16 %v523_v6, %v522_v5  ;;  %v24_v9 = vld [vmem:[%s1289_s1] sm:$0xff]  ;;  %v25_v10 = vld [vmem:[%s1289_s1 + $0x8] sm:$0xff]  ;;  %729 = vmatprep.subr.bf16.mxu0 %v728_v3  ;;  %v43_v15 = vld [vmem:[%s1289_s1 + $0x98] sm:$0xff] }
   0x5   :  { %v762_v12 = vpack.c.bf16 %v25_v10, %v24_v9  ;;  %761 = vmatprep.subr.bf16.mxu1 %v760_v7  ;;  %v764_v17 = vpack.c.bf16 %v43_v15, %v42_v14  ;;  %v524_v18 = vld [vmem:[%s1289_s1 + $0x110] sm:$0xff]  ;;  %v525_v19 = vld [vmem:[%s1289_s1 + $0x118] sm:$0xff]  ;;  %v542_v23 = vld [vmem:[%s1289_s1 + $0x1a0] sm:$0xff] }
   0x6   :  { %731 = vmatpush3.bf16.msra.mxu0 %v730_v8  ;;  %v26_v20 = vld [vmem:[%s1289_s1 + $0x10] sm:$0xff]  ;;  %v734_v21 = vpack.c.bf16 %v525_v19, %v524_v18  ;;  %v27_v22 = vld [vmem:[%s1289_s1 + $0x18] sm:$0xff]  ;;  %v543_v24 = vld [vmem:[%s1289_s1 + $0x1a8] sm:$0xff] }
   0x7   :  { %763 = vmatpush3.bf16.msra.mxu1 %v762_v12  ;;  %733 = vmatprep.subr.bf16.mxu0 %v732_v16  ;;  %v766_v25 = vpack.c.bf16 %v27_v22, %v26_v20  ;;  %v736_v26 = vpack.c.bf16 %v543_v24, %v542_v23  ;;  %v44_v27 = vld [vmem:[%s1289_s1 + $0xa0] sm:$0xff]  ;;  %v45_v28 = vld [vmem:[%s1289_s1 + $0xa8] sm:$0xff]  ;;  %v544_v35 = vld [vmem:[%s1289_s1 + $0x1b0] sm:$0xff] }
   0x8   :  { %765 = vmatprep.subr.bf16.mxu1 %v764_v17  ;;  %v526_v29 = vld [vmem:[%s1289_s1 + $0x120] sm:$0xff]  ;;  %v768_v30 = vpack.c.bf16 %v45_v28, %v44_v27  ;;  %v527_v31 = vld [vmem:[%s1289_s1 + $0x128] sm:$0xff]  ;;  %v545_v36 = vld [vmem:[%s1289_s1 + $0x1b8] sm:$0xff] }
   0x9   :  { %v28_v32 = vld [vmem:[%s1289_s1 + $0x20] sm:$0xff]  ;;  %v29_v33 = vld [vmem:[%s1289_s1 + $0x28] sm:$0xff]  ;;  %v738_v34 = vpack.c.bf16 %v527_v31, %v526_v29  ;;  %v46_v37 = vld [vmem:[%s1289_s1 + $0xb0] sm:$0xff]  ;;  %v740_v39 = vpack.c.bf16 %v545_v36, %v544_v35 }
   0xa   :  { %735 = vmatpush3.bf16.msra.mxu0 %v734_v21  ;;  %v770_v38 = vpack.c.bf16 %v29_v33, %v28_v32  ;;  %v47_v40 = vld [vmem:[%s1289_s1 + $0xb8] sm:$0xff]  ;;  %v528_v41 = vld [vmem:[%s1289_s1 + $0x130] sm:$0xff]  ;;  %v546_v46 = vld [vmem:[%s1289_s1 + $0x1c0] sm:$0xff] }
   0xb   :  { %767 = vmatpush3.bf16.msra.mxu1 %v766_v25  ;;  %737 = vmatprep.subr.bf16.mxu0 %v736_v26  ;;  %v529_v42 = vld [vmem:[%s1289_s1 + $0x138] sm:$0xff]  ;;  %v772_v43 = vpack.c.bf16 %v47_v40, %v46_v37  ;;  %v30_v44 = vld [vmem:[%s1289_s1 + $0x30] sm:$0xff]  ;;  %v547_v47 = vld [vmem:[%s1289_s1 + $0x1c8] sm:$0xff] }
   0xc   :  { %769 = vmatprep.subr.bf16.mxu1 %v768_v30  ;;  %v31_v45 = vld [vmem:[%s1289_s1 + $0x38] sm:$0xff]  ;;  %v48_v48 = vld [vmem:[%s1289_s1 + $0xc0] sm:$0xff]  ;;  %v49_v49 = vld [vmem:[%s1289_s1 + $0xc8] sm:$0xff]  ;;  %v742_v50 = vpack.c.bf16 %v529_v42, %v528_v41  ;;  %v744_v52 = vpack.c.bf16 %v547_v47, %v546_v46 }
   0xd   :  { %v774_v51 = vpack.c.bf16 %v31_v45, %v30_v44  ;;  %v530_v53 = vld [vmem:[%s1289_s1 + $0x140] sm:$0xff]  ;;  %v531_v54 = vld [vmem:[%s1289_s1 + $0x148] sm:$0xff]  ;;  %v776_v56 = vpack.c.bf16 %v49_v49, %v48_v48  ;;  %v548_v58 = vld [vmem:[%s1289_s1 + $0x1d0] sm:$0xff] }
   0xe   :  { %739 = vmatpush3.bf16.msra.mxu0 %v738_v34  ;;  %v32_v55 = vld [vmem:[%s1289_s1 + $0x40] sm:$0xff]  ;;  %v33_v57 = vld [vmem:[%s1289_s1 + $0x48] sm:$0xff]  ;;  %v549_v59 = vld [vmem:[%s1289_s1 + $0x1d8] sm:$0xff]  ;;  %v746_v62 = vpack.c.bf16 %v531_v54, %v530_v53 }
   0xf   :  { %771 = vmatpush3.bf16.msra.mxu1 %v770_v38  ;;  %741 = vmatprep.subr.bf16.mxu0 %v740_v39  ;;  %v50_v60 = vld [vmem:[%s1289_s1 + $0xd0] sm:$0xff]  ;;  %v51_v61 = vld [vmem:[%s1289_s1 + $0xd8] sm:$0xff]  ;;  %v778_v63 = vpack.c.bf16 %v33_v57, %v32_v55  ;;  %v748_v0 = vpack.c.bf16 %v549_v59, %v548_v58  ;;  %v550_v6 = vld [vmem:[%s1289_s1 + $0x1e0] sm:$0xff] }
  0x10   :  { %773 = vmatprep.subr.bf16.mxu1 %v772_v43  ;;  %v532_v1 = vld [vmem:[%s1289_s1 + $0x150] sm:$0xff]  ;;  %v533_v2 = vld [vmem:[%s1289_s1 + $0x158] sm:$0xff]  ;;  %v780_v4 = vpack.c.bf16 %v51_v61, %v50_v60  ;;  %v551_v7 = vld [vmem:[%s1289_s1 + $0x1e8] sm:$0xff] }
  0x11   :  { %v34_v3 = vld [vmem:[%s1289_s1 + $0x50] sm:$0xff]  ;;  %v35_v5 = vld [vmem:[%s1289_s1 + $0x58] sm:$0xff]  ;;  %v52_v8 = vld [vmem:[%s1289_s1 + $0xe0] sm:$0xff]  ;;  %v750_v10 = vpack.c.bf16 %v533_v2, %v532_v1  ;;  %v752_v15 = vpack.c.bf16 %v551_v7, %v550_v6 }
  0x12   :  { %743 = vmatpush3.bf16.msra.mxu0 %v742_v50  ;;  %v53_v9 = vld [vmem:[%s1289_s1 + $0xe8] sm:$0xff]  ;;  %v534_v11 = vld [vmem:[%s1289_s1 + $0x160] sm:$0xff]  ;;  %v782_v14 = vpack.c.bf16 %v35_v5, %v34_v3  ;;  %v1036_v18 = vld [vmem:[%s1290_s0 + $0x18] sm:$0xff] }
  0x13   :  { %775 = vmatpush3.bf16.msra.mxu1 %v774_v51  ;;  %745 = vmatprep.subr.bf16.mxu0 %v744_v52  ;;  %v535_v12 = vld [vmem:[%s1289_s1 + $0x168] sm:$0xff]  ;;  %v36_v13 = vld [vmem:[%s1289_s1 + $0x60] sm:$0xff]  ;;  %v784_v19 = vpack.c.bf16 %v53_v9, %v52_v8  ;;  %v552_v20 = vld [vmem:[%s1289_s1 + $0x1f0] sm:$0xff]  ;;  %v118_v23 = vrot.slane %v1036_v18, 1 }
  0x14   :  { %777 = vmatprep.subr.bf16.mxu1 %v776_v56  ;;  %v37_v16 = vld [vmem:[%s1289_s1 + $0x68] sm:$0xff]  ;;  %v553_v21 = vld [vmem:[%s1289_s1 + $0x1f8] sm:$0xff]  ;;  %v54_v25 = vld [vmem:[%s1289_s1 + $0xf0] sm:$0xff]  ;;  %v754_v27 = vpack.c.bf16 %v535_v12, %v534_v11 }
  0x15   :  { %v57_v17 = vld [vmem:[%s1290_s0 + $0x8] sm:$0xfe]  ;;  %v55_v26 = vld [vmem:[%s1289_s1 + $0xf8] sm:$0xff]  ;;  %v536_v28 = vld [vmem:[%s1289_s1 + $0x170] sm:$0xff]  ;;  %v786_v31 = vpack.c.bf16 %v37_v16, %v36_v13  ;;  %v756_v32 = vpack.c.bf16 %v553_v21, %v552_v20 }
  0x16   :  { %747 = vmatpush3.bf16.msra.mxu0 %v746_v62  ;;  %v117_v22 = vrot.slane %v57_v17, 1  ;;  %v15_v24 = vld [vmem:[%s1290_s0 + $0x8] sm:$0xff]  ;;  %v537_v29 = vld [vmem:[%s1289_s1 + $0x178] sm:$0xff]  ;;  %v38_v33 = vld [vmem:[%s1289_s1 + $0x70] sm:$0xff]  ;;  %v788_v36 = vpack.c.bf16 %v55_v26, %v54_v25 }
  0x17   :  { %779 = vmatpush3.bf16.msra.mxu1 %v778_v63  ;;  %749 = vmatprep.subr.bf16.mxu0 %v748_v0  ;;  %v56_v34 = vld [vmem:[%s1290_s0] sm:$0xfe]  ;;  %v1070_v35 = vld [vmem:[%s1290_s0 + $0x10] sm:$0xff]  ;;  %v39_v37 = vld [vmem:[%s1289_s1 + $0x78] sm:$0xff]  ;;  %v758_v40 = vpack.c.bf16 %v537_v29, %v536_v28 }
  0x18   :  { %781 = vmatprep.subr.bf16.mxu1 %v780_v4  ;;  %300 = vmatprep.mubr.f32.mxu1 %v15_v24  ;;  %v119_v30 = vsel %vm113_vm0, %v117_v22, %v118_v23  ;;  %v570_v38 = vld [vmem:[%s1289_s1 + $0x280] sm:$0xff]  ;;  %v571_v39 = vld [vmem:[%s1289_s1 + $0x288] sm:$0xff]  ;;  %v114_v41 = vrot.slane %v56_v34, 1  ;;  %v115_v42 = vrot.slane %v1070_v35, 1  ;;  %v790_v44 = vpack.c.bf16 %v39_v37, %v38_v33  ;;  %v572_v49 = vld [vmem:[%s1289_s1 + $0x290] sm:$0xff] }
  0x19   :  { %210 = vmatprep.mubr.f32.mxu0 %v119_v30  ;;  %v1085_v43 = vld [vmem:[%s1290_s0 + $0x28] sm:$0xff]  ;;  %v792_v45 = vpack.c.bf16 %v571_v39, %v570_v38  ;;  %v554_v46 = vld [vmem:[%s1289_s1 + $0x200] sm:$0xff]  ;;  %v573_v50 = vld [vmem:[%s1289_s1 + $0x298] sm:$0xff]  ;;  %v372_v38 = vrot.slane %v1036_v18, 2 }
  0x1a   :  { %751 = vmatpush3.bf16.msra.mxu0 %v750_v10  ;;  %v555_v47 = vld [vmem:[%s1289_s1 + $0x208] sm:$0xff]  ;;  %v1096_v48 = vld [vmem:[%s1290_s0 + $0x20] sm:$0xff]  ;;  %v122_v51 = vrot.slane %v1085_v43, 1  ;;  %v116_v52 = vsel %vm113_vm0, %v114_v41, %v115_v42  ;;  %v1113_v56 = vld [vmem:[%s1290_s0 + $0x38] sm:$0xff]  ;;  %v796_v57 = vpack.c.bf16 %v573_v50, %v572_v49 }
  0x1b   :  { %783 = vmatpush3.bf16.msra.mxu1 %v782_v14  ;;  %753 = vmatprep.subr.bf16.mxu0 %v752_v15  ;;  %v14_v53 = vld [vmem:[%s1290_s0] sm:$0xff]  ;;  %v794_v54 = vpack.c.bf16 %v555_v47, %v554_v46  ;;  %v120_v55 = vrot.slane %v1096_v48, 1  ;;  %v556_v58 = vld [vmem:[%s1289_s1 + $0x210] sm:$0xff]  ;;  %v557_v59 = vld [vmem:[%s1289_s1 + $0x218] sm:$0xff]  ;;  %v126_v0 = vrot.slane %v1113_v56, 1  ;;  %v380_v41 = vrot.slane %v1113_v56, 2 }
  0x1c   :  { %785 = vmatprep.subr.bf16.mxu1 %v784_v19  ;;  %v1124_v60 = vld [vmem:[%s1290_s0 + $0x30] sm:$0xff]  ;;  %v574_v61 = vld [vmem:[%s1289_s1 + $0x2a0] sm:$0xff]  ;;  %v575_v62 = vld [vmem:[%s1289_s1 + $0x2a8] sm:$0xff]  ;;  %v123_v63 = vsel %vm113_vm0, %v118_v23, %v122_v51  ;;  %v798_v1 = vpack.c.bf16 %v557_v59, %v556_v58 }
  0x1d   :  { %v121_v2 = vsel %vm113_vm0, %v115_v42, %v120_v55  ;;  %v124_v3 = vrot.slane %v1124_v60, 1  ;;  %v1139_v4 = vld [vmem:[%s1290_s0 + $0x48] sm:$0xff]  ;;  %v800_v5 = vpack.c.bf16 %v575_v62, %v574_v61  ;;  %v558_v6 = vld [vmem:[%s1289_s1 + $0x220] sm:$0xff]  ;;  %v576_v9 = vld [vmem:[%s1289_s1 + $0x2b0] sm:$0xff]  ;;  %v127_v11 = vsel %vm113_vm0, %v122_v51, %v126_v0 }
  0x1e   :  { %755 = vmatpush3.bf16.msra.mxu0 %v754_v27  ;;  %v559_v7 = vld [vmem:[%s1289_s1 + $0x228] sm:$0xff]  ;;  %v1150_v8 = vld [vmem:[%s1290_s0 + $0x40] sm:$0xff]  ;;  %v577_v10 = vld [vmem:[%s1289_s1 + $0x2b8] sm:$0xff]  ;;  %v130_v12 = vrot.slane %v1139_v4, 1  ;;  %v384_v42 = vrot.slane %v1139_v4, 2 }
  0x1f   :  { %787 = vmatpush3.bf16.msra.mxu1 %v786_v31  ;;  %757 = vmatprep.subr.bf16.mxu0 %v756_v32  ;;  %v802_v13 = vpack.c.bf16 %v559_v7, %v558_v6  ;;  %v125_v14 = vsel %vm113_vm0, %v120_v55, %v124_v3  ;;  %v128_v15 = vrot.slane %v1150_v8, 1  ;;  %v67_v16 = vld [vmem:[%s1290_s0 + $0x58] sm:$0x1]  ;;  %v804_v17 = vpack.c.bf16 %v577_v10, %v576_v9  ;;  %v560_v19 = vld [vmem:[%s1289_s1 + $0x230] sm:$0xff]  ;;  %v578_v22 = vld [vmem:[%s1289_s1 + $0x2c0] sm:$0xff] }
  0x20   :  { %789 = vmatprep.subr.bf16.mxu1 %v788_v36  ;;  %v561_v20 = vld [vmem:[%s1289_s1 + $0x238] sm:$0xff]  ;;  %v66_v21 = vld [vmem:[%s1290_s0 + $0x50] sm:$0x1]  ;;  %v579_v23 = vld [vmem:[%s1289_s1 + $0x2c8] sm:$0xff]  ;;  %v131_v24 = vsel %vm113_vm0, %v126_v0, %v130_v12  ;;  %v134_v25 = vrot.slane %v67_v16, 1  ;;  %v385_v51 = vsel %vm367_vm1, %v380_v41, %v384_v42  ;;  %v376_v6 = vrot.slane %v1085_v43, 2 }
  0x21   :  { %v806_v26 = vpack.c.bf16 %v561_v20, %v560_v19  ;;  %v129_v27 = vsel %vm113_vm0, %v124_v3, %v128_v15  ;;  %v132_v28 = vrot.slane %v66_v21, 1  ;;  %v327_v29 = vld [vmem:[%s1290_s0 + $0x8] sm:$0xfc]  ;;  %v808_v30 = vpack.c.bf16 %v579_v23, %v578_v22  ;;  %v562_v31 = vld [vmem:[%s1289_s1 + $0x240] sm:$0xff]  ;;  %v580_v33 = vld [vmem:[%s1289_s1 + $0x2d0] sm:$0xff] }
  0x22   :  { %759 = vmatpush3.bf16.msra.mxu0 %v758_v40  ;;  %v563_v32 = vld [vmem:[%s1289_s1 + $0x248] sm:$0xff]  ;;  %v581_v34 = vld [vmem:[%s1289_s1 + $0x2d8] sm:$0xff]  ;;  %v135_v36 = vsel %vm113_vm0, %v130_v12, %v134_v25  ;;  %v371_v37 = vrot.slane %v327_v29, 2  ;;  %v582_v46 = vld [vmem:[%s1289_s1 + $0x2e0] sm:$0xff]  ;;  %v374_v10 = vrot.slane %v1096_v48, 2 }
  0x23   :  { %791 = vmatpush3.bf16.msra.mxu1 %v790_v44  ;;  %793 = vmatprep.subr.bf16.mxu0 %v792_v45  ;;  %v810_v39 = vpack.c.bf16 %v563_v32, %v562_v31  ;;  %v133_v40 = vsel %vm113_vm0, %v128_v15, %v132_v28  ;;  %v812_v44 = vpack.c.bf16 %v581_v34, %v580_v33  ;;  %v583_v47 = vld [vmem:[%s1289_s1 + $0x2e8] sm:$0xff]  ;;  %v584_v55 = vld [vmem:[%s1289_s1 + $0x2f0] sm:$0xff]  ;;  %v569_v62 = vld [vmem:[%s1289_s1 + $0x278] sm:$0xff]  ;;  %v841_v15 = vmov 0.0  }
  0x24   :  { %824 = vmatprep.subr.bf16.mxu1 %v792_v45  ;;  %v564_v45 = vld [vmem:[%s1289_s1 + $0x250] sm:$0xff]  ;;  %v373_v49 = vsel %vm367_vm1, %v371_v37, %v372_v38  ;;  %v329_v0 = vld [vmem:[%s1290_s0 + $0x58] sm:$0x3]  ;;  %517 = vst [vmem:[%s1291_s3 + $0x28] sm:$0xff] %v841_v15 }
  0x25   :  { %211 = vmatmul.mubr.f32.vlgmr.msra.gmra.mrb[0].mxu0 %v116_v52  ;;  %v816_v52 = vpack.c.bf16 %v583_v47, %v582_v46  ;;  %v568_v61 = vld [vmem:[%s1289_s1 + $0x270] sm:$0xff]  ;;  %v388_v7 = vrot.slane %v329_v0, 2 }
  0x26   :  { %301 = vmatmul.mubr.f32.vlgmr.msra.gmra.mrb[0].mxu1 %v14_v53  ;;  %795 = vmatpush3.bf16.msra.mxu0 %v794_v54  ;;  %v566_v53 = vld [vmem:[%s1289_s1 + $0x260] sm:$0xff]  ;;  %v328_v9 = vld [vmem:[%s1290_s0 + $0x50] sm:$0x3] }
  0x27   :  { %832 = vmatpush3.bf16.msra.mxu1 %v794_v54  ;;  %797 = vmatprep.subr.bf16.mxu0 %v796_v57  ;;  %v567_v54 = vld [vmem:[%s1289_s1 + $0x268] sm:$0xff]  ;;  %v389_v12 = vsel %vm367_vm1, %v384_v42, %v388_v7 }
  0x28   :  { %825 = vmatprep.subr.bf16.mxu1 %v796_v57  ;;  %215 = vmatprep.mubr.f32.mxu0 %v123_v63  ;;  %v585_v57 = vld [vmem:[%s1289_s1 + $0x2f8] sm:$0xff]  ;;  %v818_v58 = vpack.c.bf16 %v567_v54, %v566_v53  ;;  %v326_v63 = vld [vmem:[%s1290_s0] sm:$0xfc] }
  0x29   :  { %305 = vmatprep.mubr.f32.mxu1 %v1036_v18  ;;  %216 = vmatmul.mubr.f32.gmra.mrb[2].mxu0 %v121_v2  ;;  %v565_v18 = vld [vmem:[%s1289_s1 + $0x258] sm:$0xff]  ;;  %v820_v59 = vpack.c.bf16 %v585_v57, %v584_v55  ;;  %v822_v2 = vpack.c.bf16 %v569_v62, %v568_v61  ;;  %v368_v3 = vrot.slane %v326_v63, 2 }
  0x2a   :  { %799 = vmatpush3.bf16.msra.mxu0 %v798_v1  ;;  %306 = vmatmul.mubr.f32.gmra.mrb[2].mxu1 %v1070_v35  ;;  %v814_v50 = vpack.c.bf16 %v565_v18, %v564_v45 }
  0x2b   :  { %833 = vmatpush3.bf16.msra.mxu1 %v798_v1  ;;  %801 = vmatprep.subr.bf16.mxu0 %v800_v5  ;;  %v369_v1 = vrot.slane %v1070_v35, 2 }
  0x2c   :  { %826 = vmatprep.subr.bf16.mxu1 %v800_v5  ;;  %220 = vmatprep.mubr.f32.mxu0 %v127_v11  ;;  %v382_v5 = vrot.slane %v1150_v8, 2  ;;  %v386_v11 = vrot.slane %v328_v9, 2 }
  0x2d   :  { %310 = vmatprep.mubr.f32.mxu1 %v1085_v43  ;;  %221 = vmatmul.mubr.f32.gmra.mrb[4].mxu0 %v125_v14  ;;  %v370_v35 = vsel %vm367_vm1, %v368_v3, %v369_v1  ;;  %v375_v43 = vsel %vm367_vm1, %v369_v1, %v374_v10 }
  0x2e   :  { %803 = vmatpush3.bf16.msra.mxu0 %v802_v13  ;;  %311 = vmatmul.mubr.f32.gmra.mrb[4].mxu1 %v1096_v48  ;;  %v381_v48 = vsel %vm367_vm1, %v376_v6, %v380_v41 }
  0x2f   :  { %834 = vmatpush3.bf16.msra.mxu1 %v802_v13  ;;  %805 = vmatprep.subr.bf16.mxu0 %v804_v17  ;;  %v387_v13 = vsel %vm367_vm1, %v382_v5, %v386_v11 }
  0x30   :  { %827 = vmatprep.subr.bf16.mxu1 %v804_v17  ;;  %225 = vmatprep.mubr.f32.mxu0 %v131_v24 }
  0x31   :  { %315 = vmatprep.mubr.f32.mxu1 %v1113_v56  ;;  %226 = vmatmul.mubr.f32.gmra.mrb[6].mxu0 %v129_v27 }
  0x32   :  { %807 = vmatpush3.bf16.msra.mxu0 %v806_v26  ;;  %316 = vmatmul.mubr.f32.gmra.mrb[6].mxu1 %v1124_v60 }
  0x33   :  { %835 = vmatpush3.bf16.msra.mxu1 %v806_v26  ;;  %809 = vmatprep.subr.bf16.mxu0 %v808_v30 }
  0x34   :  { %828 = vmatprep.subr.bf16.mxu1 %v808_v30  ;;  %230 = vmatprep.mubr.f32.mxu0 %v135_v36 }
  0x35   :  { %320 = vmatprep.mubr.f32.mxu1 %v1139_v4  ;;  %231 = vmatmul.mubr.f32.gmra.mrb[8].mxu0 %v133_v40  ;;  %v378_v4 = vrot.slane %v1124_v60, 2 }
  0x36   :  { %811 = vmatpush3.bf16.msra.mxu0 %v810_v39  ;;  %321 = vmatmul.mubr.f32.gmra.mrb[8].mxu1 %v1150_v8  ;;  %v377_v8 = vsel %vm367_vm1, %v372_v38, %v376_v6 }
  0x37   :  { %836 = vmatpush3.bf16.msra.mxu1 %v810_v39  ;;  %813 = vmatprep.subr.bf16.mxu0 %v812_v44  ;;  %v383_v60 = vsel %vm367_vm1, %v378_v4, %v382_v5  ;;  %v379_v14 = vsel %vm367_vm1, %v374_v10, %v378_v4 }
  0x38   :  { %829 = vmatprep.subr.bf16.mxu1 %v812_v44  ;;  %464 = vmatprep.mubr.f32.mxu0 %v373_v49 }
  0x39   :  { %479 = vmatprep.mubr.f32.mxu1 %v385_v51 }
  0x3a   :  { %815 = vmatpush3.bf16.msra.mxu0 %v814_v50 }
  0x3b   :  { %837 = vmatpush3.bf16.msra.mxu1 %v814_v50  ;;  %817 = vmatprep.subr.bf16.mxu0 %v816_v52 }
  0x3c   :  { %830 = vmatprep.subr.bf16.mxu1 %v816_v52 }
  0x3e   :  { %819 = vmatpush3.bf16.msra.mxu0 %v818_v58 }
  0x3f   :  { %838 = vmatpush3.bf16.msra.mxu1 %v818_v58  ;;  %821 = vmatprep.subr.bf16.mxu0 %v820_v59 }
  0x40   :  { %831 = vmatprep.subr.bf16.mxu1 %v820_v59  ;;  %v586_v59 = vld [vmem:[%s1292_s2] ss:$0 sm:$0xff] }
  0x42   :  { %823 = vmatpush3.bf16.msra.mxu0 %v822_v2 }
  0x43   :  { %839 = vmatpush3.bf16.msra.mxu1 %v822_v2 }
  0x45   :  { %465 = vmatmul.mubr.f32.vlgmr.msra.gmra.mrb[10].mxu0 %v370_v35 }
  0x46   :  { %480 = vmatmul.mubr.f32.vlgmr.msra.gmra.mrb[10].mxu1 %v383_v60  ;;  %469 = vmatprep.mubr.f32.mxu0 %v377_v8 }
  0x47   :  { %484 = vmatprep.mubr.f32.mxu1 %v389_v12 }
  0x49   :  { %470 = vmatmul.mubr.f32.gmra.mrb[12].mxu0 %v375_v43 }
  0x4a   :  { %485 = vmatmul.mubr.f32.gmra.mrb[12].mxu1 %v387_v13  ;;  %474 = vmatprep.mubr.f32.mxu0 %v381_v48 }
  0x4d   :  { %475 = vmatmul.mubr.f32.gmra.mrb[14].mxu0 %v379_v14 }
  0xf8   :  { %v619_v16 = vpop.f32.mrb[0].mxu0 }
  0xf9   :  { %v666_v17 = vpop.f32.mrb[0].mxu1  ;;  %v620_v19 = vpop.f32.mrb[1].mxu0 }
  0xfa   :  { %v621_v20 = vadd.f32 %v620_v19, %v619_v16  ;;  %v667_v21 = vpop.f32.mrb[1].mxu1 }
  0xfb   :  { %v668_v22 = vadd.f32 %v667_v21, %v666_v17 }
  0xfc   :  { %v622_v56 = vpop.f32.mrb[2].mxu0 }
  0xfd   :  { %v303_v23 = vadd.f32 %v668_v22, %v621_v20  ;;  %v669_v24 = vpop.f32.mrb[2].mxu1  ;;  %v623_v25 = vpop.f32.mrb[3].mxu0 }
  0xfe   :  { %v624_v26 = vadd.f32 %v623_v25, %v622_v56  ;;  %v670_v27 = vpop.f32.mrb[3].mxu1 }
  0xff   :  { %v671_v28 = vadd.f32 %v670_v27, %v669_v24 }
 0x100   :  { %v625_v29 = vpop.f32.mrb[4].mxu0 }
 0x101   :  { %v308_v30 = vadd.f32 %v671_v28, %v624_v26  ;;  %v672_v31 = vpop.f32.mrb[4].mxu1  ;;  %v626_v32 = vpop.f32.mrb[5].mxu0 }
 0x102   :  { %v627_v33 = vadd.f32 %v626_v32, %v625_v29  ;;  %v673_v34 = vpop.f32.mrb[5].mxu1 }
 0x103   :  { %v674_v36 = vadd.f32 %v673_v34, %v672_v31 }
 0x104   :  { %v628_v37 = vpop.f32.mrb[6].mxu0 }
 0x105   :  { %v313_v38 = vadd.f32 %v674_v36, %v627_v33  ;;  %v675_v39 = vpop.f32.mrb[6].mxu1  ;;  %v629_v40 = vpop.f32.mrb[7].mxu0 }
 0x106   :  { %v630_v41 = vadd.f32 %v629_v40, %v628_v37  ;;  %v676_v42 = vpop.f32.mrb[7].mxu1 }
 0x107   :  { %v677_v44 = vadd.f32 %v676_v42, %v675_v39 }
 0x108   :  { %v631_v45 = vpop.f32.mrb[8].mxu0 }
 0x109   :  { %v318_v18 = vadd.f32 %v677_v44, %v630_v41  ;;  %v678_v46 = vpop.f32.mrb[8].mxu1  ;;  %v632_v47 = vpop.f32.mrb[9].mxu0 }
 0x10a   :  { %v633_v49 = vadd.f32 %v632_v47, %v631_v45  ;;  %v679_v50 = vpop.f32.mrb[9].mxu1 }
 0x10b   :  { %v680_v51 = vadd.f32 %v679_v50, %v678_v46 }
 0x10d   :  { %v323_v52 = vadd.f32 %v680_v51, %v633_v49 }
 0x118   :  { %v713_v53 = vpop.f32.mrb[10].mxu0 }
 0x119   :  { %v722_v54 = vpop.f32.mrb[10].mxu1  ;;  %v714_v55 = vpop.f32.mrb[11].mxu0 }
 0x11a   :  { %v715_v57 = vadd.f32 %v714_v55, %v713_v53  ;;  %v723_v58 = vpop.f32.mrb[11].mxu1 }
 0x11b   :  { %v724_v61 = vadd.f32 %v723_v58, %v722_v54 }
 0x11c   :  { %v490_v62 = vadd.f32 %v715_v57, %v303_v23  ;;  %v716_v63 = vpop.f32.mrb[12].mxu0 }
 0x11d   :  { %v493_v0 = vadd.f32 %v724_v61, %v318_v18  ;;  %v725_v1 = vpop.f32.mrb[12].mxu1  ;;  %v717_v2 = vpop.f32.mrb[13].mxu0 }
 0x11e   :  { %v502_v3 = vadd.f32 %v586_v59, %v490_v62  ;;  %v718_v4 = vadd.f32 %v717_v2, %v716_v63  ;;  %v726_v5 = vpop.f32.mrb[13].mxu1 }
 0x11f   :  { %v505_v6 = vadd.f32 %v586_v59, %v493_v0  ;;  %v727_v7 = vadd.f32 %v726_v5, %v725_v1 }
 0x120   :  { %v507_v9 = vmax.f32 %v502_v3, 0.0  ;;  %v491_v35 = vadd.f32 %v718_v4, %v308_v30  ;;  %v719_v10 = vpop.f32.mrb[14].mxu0 }
 0x121   :  { %v510_v60 = vmax.f32 %v505_v6, 0.0  ;;  %v494_v8 = vadd.f32 %v727_v7, %v323_v52  ;;  %v720_v11 = vpop.f32.mrb[15].mxu0 }
 0x122   :  { %512 = vst [vmem:[%s1291_s3] sm:$0xff] %v507_v9  ;;  %v503_v12 = vadd.f32 %v586_v59, %v491_v35  ;;  %v721_v43 = vadd.f32 %v720_v11, %v719_v10 }
 0x123   :  { %515 = vst [vmem:[%s1291_s3 + $0x18] sm:$0xff] %v510_v60  ;;  %v506_v13 = vadd.f32 %v586_v59, %v494_v8 }
 0x124   :  { %v508_v48 = vmax.f32 %v503_v12, 0.0  ;;  %v492_v14 = vadd.f32 %v721_v43, %v313_v38 }
 0x125   :  { %v511_v15 = vmax.f32 %v506_v13, 0.0 }
 0x126   :  { %513 = vst [vmem:[%s1291_s3 + $0x8] sm:$0xff] %v508_v48  ;;  %v504_v16 = vadd.f32 %v586_v59, %v492_v14 }
 0x127   :  { %516 = vst [vmem:[%s1291_s3 + $0x20] sm:$0xff] %v511_v15 }
 0x128   :  { %v509_v17 = vmax.f32 %v504_v16, 0.0 }
 0x12a   :  { %514 = vst [vmem:[%s1291_s3 + $0x10] sm:$0xff] %v509_v17 }

</bundles_post_ra>
